<compile_context>
chip_gen: v7x
topology: tpu7x:2x2x1
jax: 0.10.0
libtpu: 0.0.40
codegen_flags: <defaults>
</compile_context>

<pallas_src>
import math

import jax
import jax.numpy as jnp
from jax.experimental import pallas as pl
from jax.experimental.pallas import tpu as pltpu


def _emb_kernel(x_ref, coef_ref, o_ref):
    # x_ref:    (tile_n, 1) in the caller's dtype (int or float)
    # coef_ref: (2, out_dim) f32, row 0 = freqs_full, row 1 = phase
    # o_ref:    (tile_n, out_dim)
    #
    # NOTE: on a partial last grid block this computes sin() on padded/garbage
    # x rows; Pallas masks the writeback, so it is harmless -- do not "fix"
    # this with a NaN check.
    xf = x_ref[...].astype(jnp.float32)                  # VPU cast, free under sin
    args = xf * coef_ref[0:1, :] + coef_ref[1:2, :]      # (tile_n, out_dim)
    o_ref[...] = jnp.sin(args).astype(o_ref.dtype)       # single lane-dense store


def _coef_and_out_dim(dim, max_period, is_int):
    """Build the stacked (freqs_full, phase) table and the output width."""
    half = dim // 2
    if is_int:
        # torch.long branch -> timestep_embedding:
        #   freqs = exp(-log(P) * k / half), layout [cos | sin | 0-pad-if-odd]
        # cos(a) == sin(a + pi/2); pad column uses freq = phase = 0 -> sin(0)=0.
        freqs = jnp.exp(-math.log(max_period)
                        * jnp.arange(half, dtype=jnp.float32) / half)
        out_dim = dim
        pad = out_dim - 2 * half
        freqs_full = jnp.concatenate(
            [freqs, freqs, jnp.zeros((pad,), jnp.float32)])
        phase = jnp.concatenate(
            [jnp.full((half,), 0.5 * jnp.pi, jnp.float32),
             jnp.zeros((half + pad,), jnp.float32)])
    else:
        # float branch:
        #   freqs = exp(-log(P) * k / (half - 1)), layout [sin | cos], no pad
        if half <= 1:
            raise ValueError(
                "SinusoidalPosEmb float path needs dim >= 4: the PyTorch "
                "module divides by (half_dim - 1), which is zero for dim < 4.")
        freqs = jnp.exp(jnp.arange(half, dtype=jnp.float32)
                        * -(math.log(max_period) / (half - 1)))
        out_dim = 2 * half   # NOTE: odd dim -> (n, dim - 1), same as PyTorch
        freqs_full = jnp.concatenate([freqs, freqs])
        phase = jnp.concatenate(
            [jnp.zeros((half,), jnp.float32),
             jnp.full((half,), 0.5 * jnp.pi, jnp.float32)])
    return jnp.stack([freqs_full, phase]), out_dim


def _pick_tile_n(n, out_dim):
    """Rows per grid step.

    ~2 MiB of f32 output per step: big enough to amortize the ~0.35 us
    per-step pipeline overhead, small enough that 2x output buffers plus the
    in-kernel temporaries fit the scoped-VMEM defaults on v5e/v6e/v7x.
    Once n >= 16 we force at least 2 grid steps so the "parallel" axis can be
    sharded across both TensorCores on v7x.
    """
    rows = max(8, (2 << 20) // (out_dim * 4))
    rows -= rows % 8                          # keep the (8, 128) rule happy
    if n >= 16:
        half_n = ((-(-n // 2)) + 7) // 8 * 8  # round_up8(cdiv(n, 2))
        rows = min(rows, half_n)
        return rows
    return n if n <= rows else rows


def sinusoidal_pos_emb(x, dim, max_period=10000, out_dtype=jnp.float32):
    """JAX/Pallas equivalent of SinusoidalPosEmb.forward(x). x is 1-D (N,)."""
    n = x.shape[0]
    is_int = jnp.issubdtype(x.dtype, jnp.integer)
    coef, out_dim = _coef_and_out_dim(dim, max_period, is_int)

    x2 = x.reshape(n, 1)                      # keep original dtype; cast in-kernel
    tile_n = _pick_tile_n(n, out_dim)
    grid = (pl.cdiv(n, tile_n),)

    bytes_x = n * jnp.dtype(x.dtype).itemsize
    bytes_out = n * out_dim * jnp.dtype(out_dtype).itemsize

    return pl.pallas_call(
        _emb_kernel,
        out_shape=jax.ShapeDtypeStruct((n, out_dim), out_dtype),
        grid=grid,
        in_specs=[
            pl.BlockSpec((tile_n, 1), lambda i: (i, 0)),    # x tiled over N
            pl.BlockSpec((2, out_dim), lambda i: (0, 0)),   # freqs/phase resident
        ],
        out_specs=pl.BlockSpec((tile_n, out_dim), lambda i: (i, 0)),
        compiler_params=pltpu.CompilerParams(
            dimension_semantics=("parallel",),              # v7x megacore
            vmem_limit_bytes=32 * 1024 * 1024),
        cost_estimate=pl.CostEstimate(
            flops=2 * n * out_dim,
            transcendentals=n * out_dim,
            bytes_accessed=bytes_x + 8 * out_dim + bytes_out),
    )(x2, coef)


# ---------------------------------------------------------------------------
# Pure-JAX references (mirror the PyTorch module exactly).
# ---------------------------------------------------------------------------
def _ref_float(x, dim, max_period=10000):
    half = dim // 2
    emb = math.log(max_period) / (half - 1)
    emb = jnp.exp(jnp.arange(half, dtype=jnp.float32) * -emb)
    emb = x.astype(jnp.float32)[:, None] * emb[None, :]
    return jnp.concatenate([jnp.sin(emb), jnp.cos(emb)], axis=-1)


def _ref_int(x, dim, max_period=10000):
    half = dim // 2
    freqs = jnp.exp(-math.log(max_period)
                    * jnp.arange(half, dtype=jnp.float32) / half)
    args = x.astype(jnp.float32)[:, None] * freqs[None, :]
    emb = jnp.concatenate([jnp.cos(args), jnp.sin(args)], axis=-1)
    if dim % 2:
        emb = jnp.concatenate([emb, jnp.zeros_like(emb[:, :1])], axis=-1)
    return emb


if __name__ == "__main__":
    key = jax.random.PRNGKey(0)

    # Tolerance note: the fused sin(a + pi/2) form equals cos(a) only up to
    # the f32 rounding of the phase add / range reduction; for args up to
    # ~1e3 rad that is ~1e-4, so compare at atol=1e-3.
    TOL = 1e-3

    # Float timestep path (main forward body): n=8 timesteps, dim=32.
    n, dim = 8, 32
    x_float = jax.random.uniform(key, (n,), dtype=jnp.float32) * 1000.0
    out_f = jax.block_until_ready(sinusoidal_pos_emb(x_float, dim))
    assert out_f.shape == (n, dim)
    assert jnp.allclose(out_f, _ref_float(x_float, dim), atol=TOL)

    # Integer (torch.long) path -> timestep_embedding semantics (even dim).
    x_int = jax.random.randint(key, (n,), 0, 1000, dtype=jnp.int32)
    out_i = jax.block_until_ready(sinusoidal_pos_emb(x_int, dim))
    assert out_i.shape == (n, dim)
    assert jnp.allclose(out_i, _ref_int(x_int, dim), atol=TOL)

    # Integer path with odd dim -> pad column comes from sin(0*x + 0) = 0.
    out_odd = jax.block_until_ready(sinusoidal_pos_emb(x_int, 33))
    assert out_odd.shape == (n, 33)
    assert jnp.allclose(out_odd, _ref_int(x_int, 33), atol=TOL)

    # Larger N -> exercises the multi-step grid (>= 2 steps, v7x megacore)
    # and a partial last block.
    n_big, dim_big = 600, 128
    x_big = (jax.random.uniform(jax.random.PRNGKey(1), (n_big,),
                                dtype=jnp.float32) * 1000.0)
    out_big = jax.block_until_ready(sinusoidal_pos_emb(x_big, dim_big))
    assert out_big.shape == (n_big, dim_big)
    assert jnp.allclose(out_big, _ref_float(x_big, dim_big), atol=TOL)

    # Optional bf16 output (halves the HBM writeback on v5e/v6e).
    out_bf16 = jax.block_until_ready(
        sinusoidal_pos_emb(x_float, dim, out_dtype=jnp.bfloat16))
    assert out_bf16.dtype == jnp.bfloat16 and out_bf16.shape == (n, dim)
    assert jnp.allclose(out_bf16.astype(jnp.float32),
                        _ref_float(x_float, dim), atol=2e-2)

    print("KERNEL_OK")
</pallas_src>

<mosaic_0001>
module attributes {stable_mosaic.version = 11 : i64} {
  func.func @_emb_kernel(%arg0: i32, %arg1: memref<8x1xf32, #tpu.memory_space<vmem>>, %arg2: memref<2x32xf32, #tpu.memory_space<vmem>>, %arg3: memref<8x32xf32, #tpu.memory_space<vmem>>) attributes {dimension_semantics = [#tpu.dimension_semantics<parallel>], iteration_bounds = array<i64: 1>, scalar_prefetch = 0 : i64, scratch_operands = 0 : i64, tpu.core_type = #tpu.core_type<tc>, window_params = [{transform_indices = @transform_0, window_bounds = array<i64: 8, 1>}, {pipeline_mode = #tpu.pipeline_mode<synchronous>, transform_indices = @transform_1, window_bounds = array<i64: 2, 32>}, {transform_indices = @transform_2, window_bounds = array<i64: 8, 32>}]} {
    %c0 = arith.constant 0 : index
    %c0_0 = arith.constant 0 : index
    %0 = vector.load %arg1[%c0, %c0_0] : memref<8x1xf32, #tpu.memory_space<vmem>>, vector<8x1xf32>
    %c0_1 = arith.constant 0 : index
    %c0_2 = arith.constant 0 : index
    %1 = vector.load %arg2[%c0_1, %c0_2] : memref<2x32xf32, #tpu.memory_space<vmem>>, vector<1x32xf32>
    %2 = vector.broadcast %0 : vector<8x1xf32> to vector<8x32xf32>
    %3 = vector.broadcast %1 : vector<1x32xf32> to vector<8x32xf32>
    %4 = arith.mulf %2, %3 : vector<8x32xf32>
    %c1 = arith.constant 1 : index
    %c0_3 = arith.constant 0 : index
    %5 = vector.load %arg2[%c1, %c0_3] : memref<2x32xf32, #tpu.memory_space<vmem>>, vector<1x32xf32>
    %6 = vector.broadcast %5 : vector<1x32xf32> to vector<8x32xf32>
    %7 = arith.addf %4, %6 : vector<8x32xf32>
    %8 = math.sin %7 : vector<8x32xf32>
    %c0_4 = arith.constant 0 : index
    %c0_5 = arith.constant 0 : index
    %9 = vector.load %arg3[%c0_4, %c0_5] : memref<8x32xf32, #tpu.memory_space<vmem>>, vector<8x32xf32>
    tpu.vector_store %arg3[%c0_4, %c0_5], %8 {strides = array<i32>} : memref<8x32xf32, #tpu.memory_space<vmem>>, vector<8x32xf32>,
    return
  }
  func.func @transform_0(%arg0: i32) -> (i32, i32) {
    %c0_i32 = arith.constant 0 : i32
    %c0_i32_0 = arith.constant 0 : i32
    return %arg0, %c0_i32 : i32, i32
  }
  func.func @transform_1(%arg0: i32) -> (i32, i32) {
    %c0_i32 = arith.constant 0 : i32
    %c0_i32_0 = arith.constant 0 : i32
    %c0_i32_1 = arith.constant 0 : i32
    return %c0_i32, %c0_i32_0 : i32, i32
  }
  func.func @transform_2(%arg0: i32) -> (i32, i32) {
    %c0_i32 = arith.constant 0 : i32
    %c0_i32_0 = arith.constant 0 : i32
    return %arg0, %c0_i32 : i32, i32
  }
}

</mosaic_0001>

<bundles_post_ra>
// kernel: tpu_custom_call.1
= control target key start
LH: loop header
LB: loop body
LE: loop exit
PB: predicated region body
PF: predicated region fallthrough
CT: control target
= control target key end

     0   :  { %v197_v1 = vmov 0   ;;  %s262_s0 = inlined_call_operand.vmem [shape: f32[8,1], index: 0, kind: input, shape index: {}]   ;;  %s263_s1 = inlined_call_operand.vmem [shape: f32[2,32], index: 1, kind: input, shape index: {}]   ;;  %s264_s2 = inlined_call_operand.hbm [shape: f32[8,32], index: 2, kind: output, shape index: {}]  }
   0x1   :  { %v12_v0 = vld [vmem:[%s262_s0] sm:$0xff]  ;;  %168 = vset.pattern.permute.xlu0 %v197_v1 }
   0x2   :  { %16 = vperm.xlu0 %168, %v12_v0  }
   0x3   :  { %7 = vsyncpa [#allocation3], 0  ;;  %v150_v2 = vld [vmem:[%s263_s1] ss:$0 sm:$0xff]  ;;  %v151_v3 = vld [vmem:[%s263_s1 + $0x1] ss:$0 sm:$0xff] }
   0x4   :  { %v198_v18 = vmov 2102212464   ;;  %v199_v20 = vmov 920167782   ;;  %v200_v24 = vmov 1326507024  }
   0x5   :  { %v201_v26 = vmov 683565275   ;;  %v202_v28 = vmov 2475754826   ;;  %v203_v31 = vmov 2131351028  }
   0x6   :  { %s204_s0 = smov [#allocation2]   ;;  %vm134_vm12 = vcmask 261120  }
   0x7   :  { %s142_s1 = sshll.u32 %s204_s0, 4  ;;  %s143_s1 = int_to_ptr.vmem [resolvable:$true] %s142_s1 }
   0x8   :  { %s173_s15 = scalar_lea.vmem %s143_s1, 128  ;;  %p178_p1 = scmp.lt.s32.totalorder %s143_s1, %s143_s1 }
   0x9   :  { %p174_p0 = scmp.ne.s32.totalorder %s143_s1, %s173_s15  ;;  %p179_p2 = scmp.lt.s32.totalorder %s173_s15, %s173_s15 }
   0xb   :  { %p180_p3 = por %p179_p2, %p178_p1 }
   0xd   :  { %p181_p4 = pnand %p180_p3, %p174_p0 }
  0x81   :  { %v17_v4 = vpop.permute.xlu0 %16 }
  0x82   :  { %v23_v5 = vmul.f32 %v150_v2, %v17_v4 }
  0x84   :  { %v229_v6 = vadd.f32 %v151_v3, %v23_v5 }
  0x86   :  { %v33_v7 = vand.u32 2139095040, %v229_v6  ;;  %v30_v8 = vand.u32 2147483647, %v229_v6  ;;  %vm32_vm7 = vcmp.lt.s32.totalorder %v229_v6, 0  ;;  %vm122_vm13 = vweird.f32 %v229_v6 }
  0x88   :  { %v34_v9 = vshrl.u32 %v33_v7, 23  ;;  %v37_v11 = vand.u32 8388607, %v30_v8  ;;  %vm31_vm8 = vcmp.le.f32.partialorder %v30_v8, 0.7853982 }
  0x8a   :  { %v152_v10 = vadd.s32 4294967169, %v34_v9  ;;  %v38_v14 = vor.u32 8388608, %v37_v11 }
  0x8c   :  { %v40_v12 = vadd.s32 1, %v152_v10  ;;  %v78_v22 = vshll.u32 %v38_v14, 8 }
  0x8e   :  { %vm41_vm0 = vcmp.gt.s32.totalorder %v40_v12, 0 }
  0x8f   :  { %v42_v13 = vsel %vm41_vm0, %v40_v12, 0 }
  0x90   :  { %v44_v15 = vand.u32 31, %v42_v13  ;;  %v43_v16 = vshrl.u32 %v42_v13, 5 }
  0x92   :  { %v45_v17 = vsub.s32 32, %v44_v15  ;;  %v56_v19 = vshll.u32 %v198_v18, %v44_v15  ;;  %v59_v21 = vshll.u32 %v199_v20, %v44_v15  ;;  %v47_v27 = vshll.u32 %v201_v26, %v44_v15 }
  0x93   :  { %v50_v30 = vshll.u32 %v202_v28, %v44_v15  ;;  %v53_v33 = vshll.u32 %v203_v31, %v44_v15  ;;  %vm65_vm1 = vcmp.lt.s32.totalorder %v43_v16, 4  ;;  %vm62_vm2 = vcmp.lt.s32.totalorder %v43_v16, 1 }
  0x94   :  { %v57_v23 = vshrl.u32 %v199_v20, %v45_v17  ;;  %v60_v25 = vshrl.u32 %v200_v24, %v45_v17  ;;  %v48_v29 = vshrl.u32 %v202_v28, %v45_v17  ;;  %v51_v32 = vshrl.u32 %v203_v31, %v45_v17 }
  0x95   :  { %v54_v34 = vshrl.u32 %v198_v18, %v45_v17  ;;  %v46_v38 = vshrl.u32 %v201_v26, %v45_v17  ;;  %vm63_vm3 = vcmp.lt.s32.totalorder %v43_v16, 2  ;;  %vm64_vm4 = vcmp.lt.s32.totalorder %v43_v16, 3 }
  0x96   :  { %v58_v35 = vor.u32 %v57_v23, %v56_v19  ;;  %v61_v36 = vor.u32 %v60_v25, %v59_v21  ;;  %v49_v37 = vor.u32 %v48_v29, %v47_v27  ;;  %v52_v39 = vor.u32 %v51_v32, %v50_v30 }
  0x97   :  { %v55_v40 = vor.u32 %v54_v34, %v53_v33 }
  0x98   :  { %v71_v41 = vsel %vm65_vm1, %v58_v35, 920167782  ;;  %v75_v42 = vsel %vm65_vm1, %v61_v36, 1326507024  ;;  %v70_v44 = vsel %vm62_vm2, %v49_v37, %v52_v39  ;;  %v66_v47 = vsel %vm62_vm2, %v46_v38, %v49_v37 }
  0x99   :  { %v67_v43 = vsel %vm65_vm1, %v55_v40, 2102212464  ;;  %v72_v45 = vsel %vm64_vm4, %v55_v40, %v71_v41  ;;  %v74_v46 = vsel %vm62_vm2, %v52_v39, %v55_v40  ;;  %v76_v50 = vsel %vm64_vm4, %v58_v35, %v75_v42 }
  0x9a   :  { %v68_v48 = vsel %vm64_vm4, %v52_v39, %v67_v43  ;;  %v73_v49 = vsel %vm63_vm3, %v70_v44, %v72_v45  ;;  %v77_v51 = vsel %vm63_vm3, %v74_v46, %v76_v50 }
  0x9b   :  { %v235_v52 = vmul.u32.u64.low %v78_v22, %v73_v49  ;;  %v236_v53 = vmul.u32.u64.high %v78_v22, %v73_v49, %v235_v52  ;;  %v238_v54 = vmul.u32.u64.low %v78_v22, %v77_v51  ;;  %v239_v55 = vmul.u32.u64.high %v78_v22, %v77_v51, %v238_v54 }
  0x9c   :  { %v69_v56 = vsel %vm63_vm3, %v66_v47, %v68_v48 }
  0x9d   :  { %v88_v57 = vadd.s32 1, %v236_v53  ;;  %v85_v58 = vmul.u32 %v78_v22, %v69_v56  ;;  %vm87_vm5 = vc.u32 %v239_v55, %v235_v52  ;;  %v86_v7 = vadd.s32 %v235_v52, %v239_v55 }
  0x9f   :  { %v89_v59 = vsel %vm87_vm5, %v88_v57, %v236_v53 }
  0xa0   :  { %v90_v60 = vadd.s32 %v89_v59, %v85_v58 }
  0xa2   :  { %v91_v61 = vadd.s32 536870912, %v90_v60 }
  0xa4   :  { %v92_v62 = vshrl.u32 %v91_v61, 30 }
  0xa6   :  { %v93_v63 = vshll.u32 %v92_v62, 30  ;;  %v116_v20 = vsub.s32 4, %v92_v62 }
  0xa8   :  { %v94_v0 = vsub.s32 %v90_v60, %v93_v63  ;;  %v117_v23 = vsel %vm32_vm7, %v116_v20, %v92_v62 }
  0xa9   :  { %v119_v25 = vsel %vm31_vm8, 0, %v117_v23 }
  0xaa   :  { %v96_v1 = vsub.s32 0, %v94_v0  ;;  %v123_v26 = vadd.s32 3, %v119_v25 }
  0xac   :  { %v153_v2 = vmin.u32 %v96_v1, %v94_v0  ;;  %v124_v27 = vand.u32 3, %v123_v26 }
  0xae   :  { %v98_v3 = vclz %v153_v2  ;;  %vm129_vm9 = vcmp.eq.s32.totalorder %v124_v27, 2  ;;  %vm126_vm10 = vcmp.eq.s32.totalorder %v124_v27, 0  ;;  %vm125_vm11 = vcmp.lt.s32.totalorder %v124_v27, 2 }
  0xb0   :  { %v154_v4 = vadd.s32 4294967294, %v98_v3 }
  0xb2   :  { %vm155_vm6 = vcmp.lt.s32.totalorder %v154_v4, 0 }
  0xb3   :  { %v101_v5 = vsel %vm155_vm6, 0, %v154_v4 }
  0xb4   :  { %v102_v9 = vsub.s32 32, %v101_v5  ;;  %v106_v10 = vsub.s32 4294967266, %v101_v5  ;;  %v103_v11 = vshll.u32 %v94_v0, %v101_v5 }
  0xb6   :  { %v104_v12 = vshrl.u32 %v86_v7, %v102_v9  ;;  %v107_v13 = vadd.s32 127, %v106_v10 }
  0xb8   :  { %v105_v14 = vor.u32 %v104_v12, %v103_v11  ;;  %v108_v15 = vshll.u32 %v107_v13, 23 }
  0xba   :  { %v109_v16 = vor.u32 4788187, %v108_v15  ;;  %v112_v18 = vcvt.s32.f32 %v105_v14 }
  0xbc   :  { %v110_v17 = vand.u32 2147483647, %v109_v16 }
  0xbe   :  { %v113_v19 = vmul.f32 %v112_v18, %v110_v17 }
  0xc0   :  { %v114_v21 = vxor.u32 2147483648, %v113_v19 }
  0xc2   :  { %v115_v22 = vsel %vm32_vm7, %v114_v21, %v113_v19 }
  0xc3   :  { %v118_v24 = vsel %vm31_vm8, %v229_v6, %v115_v22 }
  0xc4   :  { %169 = vcosq.f32 %v118_v24 }
  0xc5   :  { %171 = vsinq.f32 %v118_v24 }
  0xce   :  { %v170_v28 = vpop.eup %169 }
  0xcf   :  { %v172_v29 = vpop.eup %171  ;;  %v130_v30 = vxor.u32 2147483648, %v170_v28 }
  0xd0   :  { %v127_v31 = vxor.u32 2147483648, %v172_v29 }
  0xd1   :  { %v131_v32 = vsel %vm129_vm9, %v130_v30, %v172_v29 }
  0xd2   :  { %v128_v8 = vsel %vm126_vm10, %v170_v28, %v127_v31 }
  0xd3   :  { %v132_v33 = vsel %vm125_vm11, %v128_v8, %v131_v32 }
  0xd4   :  { %v133_v34 = vsel %vm122_vm13, nan, %v132_v33 }
  0xd5   :  { %135 = vst.msk [vmem:[#allocation2] sm:$0xff] %vm134_vm12, %v133_v34 }
  0xd6   :  { %184 = shalt.err (!%p181_p4)
}
  0xd7   :  { %s185_s18 = scalar_lea.hbm %s264_s2, 128 }
  0xd8   :  { %p186_p5 = scmp.ne.s32.totalorder %s264_s2, %s185_s18  ;;  %p189_p6 = scmp.lt.u32.totalorder %s185_s18, %s264_s2 }
  0xda   :  { %p191_p7 = pnand %p189_p6, %p186_p5 }
  0xdc   :  { %194 = shalt.err (!%p191_p7)
}
  0xdd   :  { %145 = dma.vmem_to_hbm [thread:$0]  %s143_s1, 128, %s264_s2, [#allocation3]  }
  0xde   :  { %195 = dma.done.wait [#allocation3], 128  }
  0xdf   :  { %196 = vsyncadd [#allocation3], 4294967168 }
  0xe0   :  { %149 = vsyncpa [#allocation3], 1 }

</bundles_post_ra>
